<compile_context>
chip_gen: v6e
topology: v6e:2x2x1
jax: 0.10.0
libtpu: 0.0.40
codegen_flags: <defaults>
</compile_context>

<pallas_src>
import functools

import jax
import jax.numpy as jnp
from jax.experimental import pallas as pl
from jax.experimental.pallas import tpu as pltpu


# ---------------------------------------------------------------------------
# Kernels
# ---------------------------------------------------------------------------
def _make_layer_kernel(*, is_first, is_last, jk_mode, f_prev, hidden):
    """One GCN layer (+ fused JK update, + fused linear head when is_last),
    specialized for a static position in the stack."""
    # (A_hat @ H) @ W costs N^2 * f_prev on the dominant term, A_hat @ (H @ W)
    # costs N^2 * hidden; pick the cheaper contraction order.
    agg_first = f_prev <= hidden

    def kernel(*refs):
        it = iter(refs)
        adj_ref = next(it)                      # (TM, N)      bf16  row tile of A_hat
        h_ref = next(it)                        # (N, f_prev)  bf16  resident
        w_ref = next(it)                        # (f_prev, H)  bf16
        b_ref = next(it)                        # (1, H)       f32
        carry_in_ref = None if is_first else next(it)   # (TM, H) f32 jk | (TM, OUT_PAD) f32 acc
        wfin_ref = bfin_ref = None
        if jk_mode == "cat":
            wfin_ref = next(it)                 # (H, OUT_PAD) bf16  per-layer W_fin slice
            if is_first:
                bfin_ref = next(it)             # (1, OUT_PAD) f32
        elif is_last:                           # jk_mode == "max": head fused here
            wfin_ref = next(it)
            bfin_ref = next(it)
        outs = list(it)                         # is_last -> (out,) ; else -> (h_out, carry_out)

        adj = adj_ref[...]
        h_prev = h_ref[...]
        w = w_ref[...]
        if agg_first:
            agg = jnp.dot(adj, h_prev, preferred_element_type=jnp.float32)
            z = jnp.dot(agg.astype(jnp.bfloat16), w, preferred_element_type=jnp.float32)
        else:
            hw = jnp.dot(h_prev, w, preferred_element_type=jnp.float32)
            z = jnp.dot(adj, hw.astype(jnp.bfloat16), preferred_element_type=jnp.float32)
        h = jnp.maximum(z + b_ref[...], 0.0)    # bias + ReLU in f32

        if jk_mode == "max":
            jk = h if is_first else jnp.maximum(carry_in_ref[...], h)
            if is_last:
                out = jnp.dot(jk.astype(jnp.bfloat16), wfin_ref[...],
                              preferred_element_type=jnp.float32) + bfin_ref[...]
                outs[0][...] = out
            else:
                outs[0][...] = h.astype(jnp.bfloat16)   # features for next layer
                outs[1][...] = jk                        # running JK max (f32)
        else:  # "cat": concat-free head, accumulate partial matmuls in f32
            part = jnp.dot(h.astype(jnp.bfloat16), wfin_ref[...],
                           preferred_element_type=jnp.float32)
            acc = part + (bfin_ref[...] if is_first else carry_in_ref[...])
            if is_last:
                outs[0][...] = acc
            else:
                outs[0][...] = h.astype(jnp.bfloat16)
                outs[1][...] = acc

    return kernel


# ---------------------------------------------------------------------------
# Wrapper
# ---------------------------------------------------------------------------
def _pick_row_tile(n, row_bytes, budget_bytes=16 * 1024 * 1024):
    """Largest row tile that divides n, is a multiple of 8 (or == n), and keeps
    the double-buffered adjacency block inside a VMEM budget that is
    conservative for v7x (64 MiB physical / 32 MiB scoped)."""
    if n % 8 != 0:
        return n
    tm = min(n, max(8, (budget_bytes // (2 * row_bytes)) // 8 * 8))
    while tm > 8 and n % tm != 0:
        tm -= 8
    return tm if n % tm == 0 else n


def gcn_jk_forward(x, adj_hat, layer_weights, layer_biases, w_fin, b_fin,
                   *, jk_mode, row_tile=None):
    if jk_mode not in ("max", "cat"):
        # TODO(synk): JumpingKnowledge 'lstm' mode (bi-LSTM + attention) has no clean
        # Pallas equivalent here; only 'max' and 'cat' are implemented.
        raise NotImplementedError(f"jk_mode={jk_mode}")

    num_layers = len(layer_weights)
    n = x.shape[0]
    hidden = layer_weights[0].shape[1]
    out_size = w_fin.shape[1]
    out_pad = ((out_size + 127) // 128) * 128          # lane-dense output stores

    tm = row_tile if row_tile is not None else _pick_row_tile(n, n * 2)
    assert n % tm == 0 and (tm % 8 == 0 or tm == n), (n, tm)
    grid = (n // tm,)

    # bf16 at the boundary: halves the O(N^2) adjacency DMA and doubles MXU rate.
    adj_b = adj_hat.astype(jnp.bfloat16)
    h = x.astype(jnp.bfloat16)
    ws = [w.astype(jnp.bfloat16) for w in layer_weights]
    bs = [jnp.asarray(b, jnp.float32).reshape(1, hidden) for b in layer_biases]
    wfin_pad = (jnp.zeros((w_fin.shape[0], out_pad), jnp.float32)
                .at[:, :out_size].set(w_fin).astype(jnp.bfloat16))
    bfin_pad = (jnp.zeros((1, out_pad), jnp.float32)
                .at[:, :out_size].set(jnp.asarray(b_fin, jnp.float32).reshape(1, out_size)))

    cparams = pltpu.CompilerParams(dimension_semantics=("parallel",))

    carry = None
    out = None
    for layer in range(num_layers):
        is_first = layer == 0
        is_last = layer == num_layers - 1
        f_prev = h.shape[1]

        operands = [adj_b, h, ws[layer], bs[layer]]
        in_specs = [
            pl.BlockSpec((tm, n), lambda i: (i, 0)),           # A_hat row tile
            pl.BlockSpec((n, f_prev), lambda i: (0, 0)),       # previous features, resident
            pl.BlockSpec((f_prev, hidden), lambda i: (0, 0)),  # W_l
            pl.BlockSpec((1, hidden), lambda i: (0, 0)),       # b_l
        ]
        if not is_first:
            operands.append(carry)
            in_specs.append(pl.BlockSpec((tm, carry.shape[1]), lambda i: (i, 0)))
        if jk_mode == "cat":
            operands.append(wfin_pad[layer * hidden:(layer + 1) * hidden, :])
            in_specs.append(pl.BlockSpec((hidden, out_pad), lambda i: (0, 0)))
            if is_first:
                operands.append(bfin_pad)
                in_specs.append(pl.BlockSpec((1, out_pad), lambda i: (0, 0)))
        elif is_last:
            operands += [wfin_pad, bfin_pad]
            in_specs += [pl.BlockSpec((hidden, out_pad), lambda i: (0, 0)),
                         pl.BlockSpec((1, out_pad), lambda i: (0, 0))]

        if is_last:
            out_shape = jax.ShapeDtypeStruct((n, out_pad), jnp.float32)
            out_specs = pl.BlockSpec((tm, out_pad), lambda i: (i, 0))
        else:
            carry_w = hidden if jk_mode == "max" else out_pad
            out_shape = (jax.ShapeDtypeStruct((n, hidden), jnp.bfloat16),
                         jax.ShapeDtypeStruct((n, carry_w), jnp.float32))
            out_specs = (pl.BlockSpec((tm, hidden), lambda i: (i, 0)),
                         pl.BlockSpec((tm, carry_w), lambda i: (i, 0)))

        flops = 2 * n * n * min(f_prev, hidden) + 2 * n * f_prev * hidden
        if is_last or jk_mode == "cat":
            flops += 2 * n * hidden * out_pad
        bytes_accessed = (n * n * 2 + n * f_prev * 2 + f_prev * hidden * 2
                          + 2 * n * (hidden + out_pad) * 4)
        cost = pl.CostEstimate(flops=int(flops), transcendentals=0,
                               bytes_accessed=int(bytes_accessed))

        kernel = _make_layer_kernel(is_first=is_first, is_last=is_last,
                                    jk_mode=jk_mode, f_prev=f_prev, hidden=hidden)
        result = pl.pallas_call(
            kernel,
            out_shape=out_shape,
            grid=grid,
            in_specs=in_specs,
            out_specs=out_specs,
            compiler_params=cparams,
            cost_estimate=cost,
        )(*operands)

        if is_last:
            out = result
        else:
            h, carry = result

    return out[:, :out_size]


# ---------------------------------------------------------------------------
# Graph preprocessing (plain JAX glue) + pure-JAX reference
# ---------------------------------------------------------------------------
def build_normalized_adjacency(edge_index, num_nodes):
    """Dense GCN normalization: A_hat = D^{-1/2} (A + I) D^{-1/2}.
    PyG parity: duplicate edges are summed; self loops are added only for nodes
    that do not already have one. edge_index[0]=src, edge_index[1]=dst
    (message flow source -> target: out[i] = sum_j A_hat[i, j] * x[j])."""
    src, dst = edge_index[0], edge_index[1]
    a = jnp.zeros((num_nodes, num_nodes), jnp.float32).at[dst, src].add(1.0)
    diag = jnp.diagonal(a)
    a = a + jnp.diag(jnp.where(diag > 0, 0.0, 1.0))
    deg = a.sum(axis=1)
    dinv_sqrt = jnp.where(deg > 0, 1.0 / jnp.sqrt(deg), 0.0)
    return dinv_sqrt[:, None] * a * dinv_sqrt[None, :]


def reference_forward(x, adj_hat, layer_weights, layer_biases, w_fin, b_fin, jk_mode):
    h = x
    outs = []
    for w, b in zip(layer_weights, layer_biases):
        h = jnp.maximum(adj_hat @ (h @ w) + b, 0.0)
        outs.append(h)
    if jk_mode == "max":
        jk = functools.reduce(jnp.maximum, outs)
    else:
        jk = jnp.concatenate(outs, axis=-1)
    return jk @ w_fin + b_fin


# ---------------------------------------------------------------------------
# Demo
# ---------------------------------------------------------------------------
if __name__ == "__main__":
    # --- model hyperparameters (mirrors GCN_JK_Model.__init__) ---
    hidden_size = 32
    layers = 2
    jk_mode = "max"          # 'cat' also supported
    output_size = 4
    in_features = 8          # GCNConv(-1, hidden) lazily infers this from x
    num_nodes = 512
    num_edges = 2048

    key = jax.random.PRNGKey(0)
    k_x, k_src, k_dst, k_w, k_b, k_wf, k_bf = jax.random.split(key, 7)

    x = jax.random.normal(k_x, (num_nodes, in_features), jnp.float32)
    src = jax.random.randint(k_src, (num_edges,), 0, num_nodes)
    dst = jax.random.randint(k_dst, (num_edges,), 0, num_nodes)
    edge_index = jnp.stack([src, dst], axis=0)   # (2, E)

    adj_hat = build_normalized_adjacency(edge_index, num_nodes)

    # deterministic synthetic parameters (shapes match the torch module)
    layer_weights, layer_biases = [], []
    w_keys = jax.random.split(k_w, layers)
    b_keys = jax.random.split(k_b, layers)
    fan_in = in_features
    for l in range(layers):
        layer_weights.append(
            0.1 * jax.random.normal(w_keys[l], (fan_in, hidden_size), jnp.float32))
        layer_biases.append(
            0.1 * jax.random.normal(b_keys[l], (1, hidden_size), jnp.float32))
        fan_in = hidden_size

    jk_dim = hidden_size if jk_mode in ("max", "lstm") else hidden_size * layers
    w_fin = 0.1 * jax.random.normal(k_wf, (jk_dim, output_size), jnp.float32)
    b_fin = 0.1 * jax.random.normal(k_bf, (1, output_size), jnp.float32)

    # row_tile=128 exercises a real multi-step "parallel" grid (4 row tiles);
    # with row_tile=None the auto-sizer would pick the largest tile that fits VMEM.
    pred = gcn_jk_forward(x, adj_hat, layer_weights, layer_biases, w_fin, b_fin,
                          jk_mode=jk_mode, row_tile=128)
    jax.block_until_ready(pred)

    assert pred.shape == (num_nodes, output_size)
    assert jnp.all(jnp.isfinite(pred))

    # loose check against an f32 pure-JAX reference (kernel runs in bf16/f32 mixed)
    ref = reference_forward(x, adj_hat, layer_weights, layer_biases, w_fin, b_fin, jk_mode)
    rel_err = float(jnp.max(jnp.abs(pred - ref)) / (jnp.max(jnp.abs(ref)) + 1e-6))
    assert rel_err < 8e-2, f"relative error too large: {rel_err}"

    print("KERNEL_OK")
</pallas_src>

<mosaic_0001>
module attributes {stable_mosaic.version = 11 : i64} {
  func.func @kernel(%arg0: i32, %arg1: memref<128x512xbf16, #tpu.memory_space<vmem>>, %arg2: memref<512x8xbf16, #tpu.memory_space<vmem>>, %arg3: memref<8x32xbf16, #tpu.memory_space<vmem>>, %arg4: memref<1x32xf32, #tpu.memory_space<vmem>>, %arg5: memref<128x32xbf16, #tpu.memory_space<vmem>>, %arg6: memref<128x32xf32, #tpu.memory_space<vmem>>) attributes {dimension_semantics = [#tpu.dimension_semantics<parallel>], iteration_bounds = array<i64: 4>, scalar_prefetch = 0 : i64, scratch_operands = 0 : i64, tpu.core_type = #tpu.core_type<tc>, window_params = [{transform_indices = @transform_0, window_bounds = array<i64: 128, 512>}, {pipeline_mode = #tpu.pipeline_mode<synchronous>, transform_indices = @transform_1, window_bounds = array<i64: 512, 8>}, {pipeline_mode = #tpu.pipeline_mode<synchronous>, transform_indices = @transform_2, window_bounds = array<i64: 8, 32>}, {pipeline_mode = #tpu.pipeline_mode<synchronous>, transform_indices = @transform_3, window_bounds = array<i64: 1, 32>}, {transform_indices = @transform_4, window_bounds = array<i64: 128, 32>}, {transform_indices = @transform_5, window_bounds = array<i64: 128, 32>}]} {
    %c0 = arith.constant 0 : index
    %c0_0 = arith.constant 0 : index
    %0 = vector.load %arg1[%c0, %c0_0] : memref<128x512xbf16, #tpu.memory_space<vmem>>, vector<128x512xbf16>
    %c0_1 = arith.constant 0 : index
    %c0_2 = arith.constant 0 : index
    %1 = vector.load %arg2[%c0_1, %c0_2] : memref<512x8xbf16, #tpu.memory_space<vmem>>, vector<512x8xbf16>
    %c0_3 = arith.constant 0 : index
    %c0_4 = arith.constant 0 : index
    %2 = vector.load %arg3[%c0_3, %c0_4] : memref<8x32xbf16, #tpu.memory_space<vmem>>, vector<8x32xbf16>
    %cst = arith.constant dense<0.000000e+00> : vector<128x8xf32>
    %3 = tpu.matmul %0, %1, %cst {dimension_numbers = #tpu.dot_dimension_numbers<[1], [0], [0], [1], [0, 0, 1, 1], [], []>} : vector<128x512xbf16>, vector<512x8xbf16>, vector<128x8xf32> -> vector<128x8xf32>
    %4 = arith.truncf %3 : vector<128x8xf32> to vector<128x8xbf16>
    %cst_5 = arith.constant dense<0.000000e+00> : vector<128x32xf32>
    %5 = tpu.matmul %4, %2, %cst_5 {dimension_numbers = #tpu.dot_dimension_numbers<[1], [0], [0], [1], [0, 0, 1, 1], [], []>} : vector<128x8xbf16>, vector<8x32xbf16>, vector<128x32xf32> -> vector<128x32xf32>
    %c0_6 = arith.constant 0 : index
    %c0_7 = arith.constant 0 : index
    %6 = vector.load %arg4[%c0_6, %c0_7] : memref<1x32xf32, #tpu.memory_space<vmem>>, vector<1x32xf32>
    %7 = vector.broadcast %6 : vector<1x32xf32> to vector<128x32xf32>
    %8 = arith.addf %5, %7 : vector<128x32xf32>
    %cst_8 = arith.constant 0.000000e+00 : f32
    %9 = vector.broadcast %cst_8 : f32 to vector<128x32xf32>
    %10 = arith.maximumf %8, %9 : vector<128x32xf32>
    %11 = arith.truncf %10 : vector<128x32xf32> to vector<128x32xbf16>
    %c0_9 = arith.constant 0 : index
    %c0_10 = arith.constant 0 : index
    %12 = vector.load %arg5[%c0_9, %c0_10] : memref<128x32xbf16, #tpu.memory_space<vmem>>, vector<128x32xbf16>
    tpu.vector_store %arg5[%c0_9, %c0_10], %11 {strides = array<i32>} : memref<128x32xbf16, #tpu.memory_space<vmem>>, vector<128x32xbf16>,
    %c0_11 = arith.constant 0 : index
    %c0_12 = arith.constant 0 : index
    %13 = vector.load %arg6[%c0_11, %c0_12] : memref<128x32xf32, #tpu.memory_space<vmem>>, vector<128x32xf32>
    tpu.vector_store %arg6[%c0_11, %c0_12], %10 {strides = array<i32>} : memref<128x32xf32, #tpu.memory_space<vmem>>, vector<128x32xf32>,
    return
  }
  func.func @transform_0(%arg0: i32) -> (i32, i32) {
    %c0_i32 = arith.constant 0 : i32
    %c0_i32_0 = arith.constant 0 : i32
    return %arg0, %c0_i32 : i32, i32
  }
  func.func @transform_1(%arg0: i32) -> (i32, i32) {
    %c0_i32 = arith.constant 0 : i32
    %c0_i32_0 = arith.constant 0 : i32
    %c0_i32_1 = arith.constant 0 : i32
    return %c0_i32, %c0_i32_0 : i32, i32
  }
  func.func @transform_2(%arg0: i32) -> (i32, i32) {
    %c0_i32 = arith.constant 0 : i32
    %c0_i32_0 = arith.constant 0 : i32
    %c0_i32_1 = arith.constant 0 : i32
    return %c0_i32, %c0_i32_0 : i32, i32
  }
  func.func @transform_3(%arg0: i32) -> (i32, i32) {
    %c0_i32 = arith.constant 0 : i32
    %c0_i32_0 = arith.constant 0 : i32
    %c0_i32_1 = arith.constant 0 : i32
    return %c0_i32, %c0_i32_0 : i32, i32
  }
  func.func @transform_4(%arg0: i32) -> (i32, i32) {
    %c0_i32 = arith.constant 0 : i32
    %c0_i32_0 = arith.constant 0 : i32
    return %arg0, %c0_i32 : i32, i32
  }
  func.func @transform_5(%arg0: i32) -> (i32, i32) {
    %c0_i32 = arith.constant 0 : i32
    %c0_i32_0 = arith.constant 0 : i32
    return %arg0, %c0_i32 : i32, i32
  }
}

</mosaic_0001>

<bundles_post_ra>
// kernel: tpu_custom_call.1
= control target key start
LH: loop header
LB: loop body
LE: loop exit
PB: predicated region body
PF: predicated region fallthrough
CT: control target
= control target key end

     0   :  { %11 = vsyncpa [#allocation3], 0  ;;  %s2095_s0 = inlined_call_operand.hbm [shape: bf16[512,512], index: 0, kind: input, shape index: {}]   ;;  %s2096_s1 = inlined_call_operand.vmem [shape: bf16[512,8], index: 1, kind: input, shape index: {}]   ;;  %s2097_s2 = inlined_call_operand.vmem [shape: bf16[8,32], index: 2, kind: input, shape index: {}]   ;;  %s2098_s3 = inlined_call_operand.vmem [shape: f32[1,32], index: 3, kind: input, shape index: {}]   ;;  %s2099_s4 = inlined_call_operand.vmem [shape: bf16[512,32], index: 4, kind: output, shape index: {0}]   ;;  %s2100_s5 = inlined_call_operand.vmem [shape: f32[512,32], index: 5, kind: output, shape index: {1}]  }
   0x1   :  { %13 = vsyncpa [#allocation3 + $0x1], 0  ;;  %s1762_s18 = smov 0   ;;  %s1764_s19 = smov 0  }
   0x2   :  { %s1766_s20 = smov 0   ;;  %s1768_s21 = smov 0  }
   0x3 LB: > { %s1262_s22 = sadd.s32 4294967295, %s1727_s21   ;;  %s1782_s23 = sadd.s32 1, %s1727_s21   ;;  %s1727_s21 = sphi %s1768_s21, %s2109_s21   ;;  %s1723_s20 = sphi %s1766_s20, %s2108_s20   ;;  %s1719_s19 = sphi %s1764_s19, %s2107_s19   ;;  %s1715_s18 = sphi %s1762_s18, %s2106_s18  }
   0x4   : > { %s23_s24 = ssub.s32 %s1727_s21, %s1782_s23  ;;  %s26_s25 = sadd.s32 1, %s1723_s20 }
   0x5   : > { %p24_p0 = scmp.eq.s32.totalorder %s23_s24, 0  ;;  %p33_p1 = scmp.ne.s32.totalorder %s1723_s20, %s1719_s19 }
   0x6   : > { %p34_p2 = scmp.eq.s32.totalorder %s1727_s21, 0  ;;  %p39_p3 = scmp.ne.s32.totalorder %s1719_s19, %s1715_s18 }
   0x7   : > { %s1792_s26 = scalar_select %p24_p0, %s1723_s20, %s26_s25  }
   0x8   : > { %p35_p4 = por %p34_p2, %p33_p1  ;;  %p40_p5 = scmp.eq.s32.totalorder %s1262_s22, 0 }
   0x9   : > { %p1550_p6 = scmp.lt.s32.totalorder %s1727_s21, 4  ;;  %s187_s28 = sand.u32 1, %s1723_s20  }
   0xa   : > { %p1797_p7 = por %p40_p5, %p39_p3  ;;  %s1266_s29 = sshll.u32 %s187_s28, 8 }
   0xb   : > { %s1368_s30 = sshll.u32 %s1727_s21, 12  ;;  %s191_s9 = scalar_lea.vmem [#allocation2], %s1266_s29 }
   0xc   : > { %s2102_s27 = scalar_select %p1797_p7, 1, 0 }
   0xd   : > { %s1806_s8 = scalar_lea.hbm %s2095_s0, %s1368_s30  ;;  %s199_s10 = sshll.u32 %s191_s9, 4  ;;  %s1808_s10 = int_to_ptr.vmem [resolvable:$true] %s199_s10 }
   0xe   : > { %p1810_p8 = pnand %p1550_p6, %p35_p4  ;;  %s1815_s12 = scalar_lea.sflag [#allocation3], %s187_s28 }
   0xf   : > { %s1665_s13 = scalar_lea.hbm %s1806_s8, 4096  ;;  %s1670_s16 = scalar_lea.hbm %s2095_s0, 16384 }
  0x10   : > { %p1666_p10 = scmp.ne.s32.totalorder %s1806_s8, %s1665_s13  ;;  %p1667_p11 = pneg %p1810_p8 }
  0x11   : > { %p1671_p0 = scmp.lt.s32.totalorder %s1806_s8, %s2095_s0  ;;  %p1672_p1 = scmp.lt.s32.totalorder %s1670_s16, %s1665_s13 }
  0x12   : > { %p1668_p12 = pnand %p1667_p11, %p1666_p10 }
  0x13   : > { %p1673_p2 = por %p1672_p1, %p1671_p0 }
  0x14   : > { %p1669_p13 = pneg %p1668_p12 }
  0x16   : > { %p1674_p3 = pnand %p1673_p2, %p1669_p13 }
  0x18   : > { %1677 = shalt.err (!%p1674_p3)
}
  0x19   : > { %s1678_s24 = scalar_lea.vmem %s1808_s10, 4096  ;;  %s1729_s25 = smov [#allocation2]  }
  0x1a   : > { %p1679_p4 = scmp.ne.s32.totalorder %s1808_s10, %s1678_s24  ;;  %s1683_s28 = sshll.u32 %s1729_s25, 4  ;;  %s1684_s28 = int_to_ptr.vmem [resolvable:$false] %s1683_s28 }
  0x1b   : > { %s1685_s29 = scalar_lea.vmem %s1684_s28, 8192  ;;  %p1686_p10 = scmp.lt.s32.totalorder %s1808_s10, %s1684_s28 }
  0x1c   : > { %p1681_p5 = pnand %p1679_p4, %p1667_p11  ;;  %p1687_p12 = scmp.lt.s32.totalorder %s1685_s29, %s1678_s24 }
  0x1e   : > { %p1682_p6 = pneg %p1681_p5  ;;  %p1688_p9 = por %p1687_p12, %p1686_p10 }
  0x20   : > { %p1689_p7 = pnand %p1688_p9, %p1682_p6 }
  0x22   : > { %1692 = shalt.err (!%p1689_p7)
}
  0x23   : > { %s1730_s30 = smov 256   ;;  %s1731_s6 = smov 16  }
  0x24   : > { %1549 = dma.hbm_to_vmem [thread:$0]  (!%p1810_p8), %s1806_s8, 4096, %s1808_s10, %s1815_s12, %s1730_s30, %s1730_s30, %s1731_s6  }
  0x25   : > { %p207_p11 = scmp.lt.s32.totalorder %s1727_s21, 5  ;;  %p2104_p13 = scmp.ge.s32.totalorder %s1727_s21, 1 }
  0x27   : > { %p208_p0 = pnand %p2104_p13, %p207_p11 }
  0x28   : > { %s213_s7 = sand.u32 (!%p208_p0), 1, %s1719_s19   ;;  %p2105_p7 = scmp.ne.s32.totalorder (!%p208_p0), %s2102_s27, 0 }
  0x29   : > { %211 = sbr.rel (%p208_p0) target bundleno = 549 (0x225), region = 36  ;;  %s1271_s9 = sshll.u32 (!%p208_p0), %s213_s7, 8 }
  0x2a   : > { %s214_s13 = scalar_lea.sflag (!%p208_p0), [#allocation3], %s213_s7  ;;  %s1840_s14 = scalar_lea.vmem (!%p208_p0), [#allocation2], %s1271_s9 }
  0x2e   : > { %1710 = dma.done.wait (%p2105_p7), %s214_s13, 4096  }
  0x2f   : > { %1712 = vsyncadd (%p2105_p7), %s214_s13, 4294963200  ;;  %v1585_v0 = vld [vmem:[%s2096_s1 + $0x78] sm:$0xff]   ;;  %v1589_v4 = vld [vmem:[%s2096_s1 + $0x70] sm:$0xff]   ;;  %vm946_vm0 = vcmask 1043456   ;;  %vm921_vm1 = vcmask 64512   ;;  %vm1144_vm2 = vcmask 261120  }
  0x30   : > { %v1586_v1 = vld [vmem:[%s2096_s1 + $0xf8] sm:$0xff]   ;;  %1385 = vmatprep.subr.bf16.mxu0 %v1585_v0  ;;  %v1590_v5 = vld [vmem:[%s2096_s1 + $0xf0] sm:$0xff]   ;;  %v1593_v8 = vld [vmem:[%s2096_s1 + $0x68] sm:$0xff]   ;;  %vm1127_vm3 = vcmask 257024  }
  0x31   : > { %v1587_v2 = vld [vmem:[%s2096_s1 + $0x38] sm:$0xff]   ;;  %1449 = vmatprep.subr.bf16.mxu1 %v1586_v1  ;;  %v1591_v6 = vld [vmem:[%s2096_s1 + $0x30] sm:$0xff]   ;;  %v1594_v9 = vld [vmem:[%s2096_s1 + $0xe8] sm:$0xff]  }
  0x32   : > { %v1588_v3 = vld [vmem:[%s2096_s1 + $0xb8] sm:$0xff]   ;;  %1386 = vmatpush3.bf16.msra.mxu0 %v1587_v2  ;;  %v1592_v7 = vld [vmem:[%s2096_s1 + $0xb0] sm:$0xff]   ;;  %v1595_v10 = vld [vmem:[%s2096_s1 + $0x28] sm:$0xff]  }
  0x33   : > { %1450 = vmatpush3.bf16.msra.mxu1 %v1588_v3  ;;  %1387 = vmatprep.subr.bf16.mxu0 %v1589_v4  ;;  %v1596_v11 = vld [vmem:[%s2096_s1 + $0xa8] sm:$0xff]   ;;  %v1597_v12 = vld [vmem:[%s2096_s1 + $0x60] sm:$0xff]   ;;  %v1601_v16 = vld [vmem:[%s2096_s1 + $0x58] sm:$0xff]  }
  0x34   : > { %1451 = vmatprep.subr.bf16.mxu1 %v1590_v5  ;;  %v1598_v13 = vld [vmem:[%s2096_s1 + $0xe0] sm:$0xff]   ;;  %v1602_v17 = vld [vmem:[%s2096_s1 + $0xd8] sm:$0xff]   ;;  %v1605_v20 = vld [vmem:[%s2096_s1 + $0x50] sm:$0xff]  }
  0x35   : > { %v1599_v14 = vld [vmem:[%s2096_s1 + $0x20] sm:$0xff]   ;;  %v1603_v18 = vld [vmem:[%s2096_s1 + $0x18] sm:$0xff]   ;;  %v1606_v21 = vld [vmem:[%s2096_s1 + $0xd0] sm:$0xff]  }
  0x36   : > { %1388 = vmatpush3.bf16.msra.mxu0 %v1591_v6  ;;  %v1600_v15 = vld [vmem:[%s2096_s1 + $0xa0] sm:$0xff]   ;;  %v1604_v19 = vld [vmem:[%s2096_s1 + $0x98] sm:$0xff]   ;;  %v1607_v22 = vld [vmem:[%s2096_s1 + $0x10] sm:$0xff]  }
  0x37   : > { %1452 = vmatpush3.bf16.msra.mxu1 %v1592_v7  ;;  %1389 = vmatprep.subr.bf16.mxu0 %v1593_v8  ;;  %v1608_v23 = vld [vmem:[%s2096_s1 + $0x90] sm:$0xff]   ;;  %v1609_v24 = vld [vmem:[%s2096_s1 + $0x48] sm:$0xff]   ;;  %v1613_v28 = vld [vmem:[%s2096_s1 + $0x40] sm:$0xff]  }
  0x38   : > { %1453 = vmatprep.subr.bf16.mxu1 %v1594_v9  ;;  %v1610_v25 = vld [vmem:[%s2096_s1 + $0xc8] sm:$0xff]   ;;  %v1614_v29 = vld [vmem:[%s2096_s1 + $0xc0] sm:$0xff]  }
  0x39   : > { %v1611_v26 = vld [vmem:[%s2096_s1 + $0x8] sm:$0xff]   ;;  %v1615_v30 = vld [vmem:[%s2096_s1] sm:$0xff]  }
  0x3a   : > { %1390 = vmatpush3.bf16.msra.mxu0 %v1595_v10  ;;  %v1612_v27 = vld [vmem:[%s2096_s1 + $0x88] sm:$0xff]   ;;  %v1616_v31 = vld [vmem:[%s2096_s1 + $0x80] sm:$0xff]  }
  0x3b   : > { %1454 = vmatpush3.bf16.msra.mxu1 %v1596_v11  ;;  %1391 = vmatprep.subr.bf16.mxu0 %v1597_v12  ;;  %v1617_v32 = vld [vmem:[%s1840_s14] ss:$16 sps:$4 sm:$0xff]   ;;  %v1619_v33 = vld [vmem:[%s1840_s14 + $0x4] ss:$16 sps:$4 sm:$0xff]   ;;  %v1620_v34 = vld [vmem:[%s1840_s14 + $0x8] ss:$16 sps:$4 sm:$0xff]  }
  0x3c   : > { %1455 = vmatprep.subr.bf16.mxu1 %v1598_v13  ;;  %v1622_v35 = vld [vmem:[%s1840_s14 + $0xc] ss:$16 sps:$4 sm:$0xff]   ;;  %744 = vmatprep.mubr.bf16.mxu0 %v1619_v33  ;;  %v1623_v36 = vld [vmem:[%s1840_s14 + $0x24] ss:$16 sps:$4 sm:$0xff]   ;;  %v1627_v38 = vld [vmem:[%s1840_s14 + $0x20] ss:$16 sps:$4 sm:$0xff]  }
  0x3d   : > { %841 = vmatprep.mubr.bf16.mxu1 %v1622_v35  ;;  %v1625_v37 = vld [vmem:[%s1840_s14 + $0x2c] ss:$16 sps:$4 sm:$0xff]   ;;  %v1628_v39 = vld [vmem:[%s1840_s14 + $0x28] ss:$16 sps:$4 sm:$0xff]   ;;  %v1629_v40 = vld [vmem:[%s1840_s14 + $0x44] ss:$16 sps:$4 sm:$0xff]  }
  0x3e   : > { %1392 = vmatpush3.bf16.msra.mxu0 %v1599_v14  ;;  %v1631_v41 = vld [vmem:[%s1840_s14 + $0x4c] ss:$16 sps:$4 sm:$0xff]   ;;  %v1633_v42 = vld [vmem:[%s1840_s14 + $0x40] ss:$16 sps:$4 sm:$0xff]   ;;  %v1634_v43 = vld [vmem:[%s1840_s14 + $0x48] ss:$16 sps:$4 sm:$0xff]  }
  0x3f   : > { %1456 = vmatpush3.bf16.msra.mxu1 %v1600_v15  ;;  %1393 = vmatprep.subr.bf16.mxu0 %v1601_v16  ;;  %v1635_v44 = vld [vmem:[%s1840_s14 + $0x64] ss:$16 sps:$4 sm:$0xff]   ;;  %v1637_v45 = vld [vmem:[%s1840_s14 + $0x6c] ss:$16 sps:$4 sm:$0xff]   ;;  %v359_v46 = vld [vmem:[%s2097_s2] sm:$0xf] }
  0x40   : > { %1457 = vmatprep.subr.bf16.mxu1 %v1602_v17  ;;  %v948_v47 = vsel %vm946_vm0, %v359_v46, 0  ;;  %v1639_v48 = vld [vmem:[%s1840_s14 + $0x60] ss:$16 sps:$4 sm:$0xff]   ;;  %v1640_v49 = vld [vmem:[%s1840_s14 + $0x68] ss:$16 sps:$4 sm:$0xff]  }
  0x41   : > { %v1641_v50 = vld [vmem:[%s1840_s14 + $0x84] ss:$16 sps:$4 sm:$0xff]   ;;  %v1643_v51 = vld [vmem:[%s1840_s14 + $0x8c] ss:$16 sps:$4 sm:$0xff]   ;;  %v1645_v52 = vld [vmem:[%s1840_s14 + $0x80] ss:$16 sps:$4 sm:$0xff]  }
  0x42   : > { %1394 = vmatpush3.bf16.msra.mxu0 %v1603_v18  ;;  %v1646_v53 = vld [vmem:[%s1840_s14 + $0x88] ss:$16 sps:$4 sm:$0xff]   ;;  %v1647_v54 = vld [vmem:[%s1840_s14 + $0xa4] ss:$16 sps:$4 sm:$0xff]   ;;  %v1649_v55 = vld [vmem:[%s1840_s14 + $0xac] ss:$16 sps:$4 sm:$0xff]  }
  0x43   : > { %1458 = vmatpush3.bf16.msra.mxu1 %v1604_v19  ;;  %1395 = vmatprep.subr.bf16.mxu0 %v1605_v20  ;;  %v1651_v56 = vld [vmem:[%s1840_s14 + $0xa0] ss:$16 sps:$4 sm:$0xff]   ;;  %v1652_v57 = vld [vmem:[%s1840_s14 + $0xa8] ss:$16 sps:$4 sm:$0xff]   ;;  %v1653_v58 = vld [vmem:[%s1840_s14 + $0xc4] ss:$16 sps:$4 sm:$0xff]  }
  0x44   : > { %1459 = vmatprep.subr.bf16.mxu1 %v1606_v21  ;;  %v1655_v59 = vld [vmem:[%s1840_s14 + $0xcc] ss:$16 sps:$4 sm:$0xff]   ;;  %v1657_v60 = vld [vmem:[%s1840_s14 + $0xc0] ss:$16 sps:$4 sm:$0xff]   ;;  %v1658_v61 = vld [vmem:[%s1840_s14 + $0xc8] ss:$16 sps:$4 sm:$0xff]  }
  0x45   : > { %v1659_v62 = vld [vmem:[%s1840_s14 + $0xe4] ss:$16 sps:$4 sm:$0xff]   ;;  %v1661_v63 = vld [vmem:[%s1840_s14 + $0xec] ss:$16 sps:$4 sm:$0xff]   ;;  %v1663_v0 = vld [vmem:[%s1840_s14 + $0xe0] ss:$16 sps:$4 sm:$0xff]  }
  0x46   : > { %1396 = vmatpush3.bf16.msra.mxu0 %v1607_v22  ;;  %v1664_v1 = vld [vmem:[%s1840_s14 + $0xe8] ss:$16 sps:$4 sm:$0xff]   ;;  %s1272_s14 = sshll.u32 %s1262_s22, 4 }
  0x47   : > { %1460 = vmatpush3.bf16.msra.mxu1 %v1608_v23  ;;  %1397 = vmatprep.subr.bf16.mxu0 %v1609_v24  ;;  %p251_p8 = scmp.lt.s32.totalorder %s1272_s14, 63 }
  0x48   : > { %1461 = vmatprep.subr.bf16.mxu1 %v1610_v25 }
  0x49   : > { %s2111_s14 = smov (!%p251_p8, %s1272_s14), 63 }
  0x4a   : > { %1398 = vmatpush3.bf16.msra.mxu0 %v1611_v26  ;;  %s1275_s6 = sshll.u32 %s2111_s14, 3  ;;  %s1273_s7 = sshll.u32 %s2111_s14, 2 }
  0x4b   : > { %1462 = vmatpush3.bf16.msra.mxu1 %v1612_v27  ;;  %1399 = vmatprep.subr.bf16.mxu0 %v1613_v28  ;;  %s1996_s15 = scalar_lea.vmem %s2100_s5, %s1275_s6  ;;  %s2002_s16 = scalar_lea.vmem %s2099_s4, %s1273_s7 }
  0x4c   : > { %1463 = vmatprep.subr.bf16.mxu1 %v1614_v29 }
  0x4e   : > { %1400 = vmatpush3.bf16.msra.mxu0 %v1615_v30 }
  0x4f   : > { %1464 = vmatpush3.bf16.msra.mxu1 %v1616_v31  ;;  %1542 = vmatprep.subr.msk.bf16.mxu0 %vm946_vm0, %v359_v46 }
  0x50   : > { %1543 = vmatprep.subr.msk.bf16.mxu1 %vm946_vm0, %v359_v46 }
  0x51   : > { %745 = vmatmul.mubr.bf16.vlgmr.msra.gmra.mxu0 %v1617_v32 }
  0x52   : > { %842 = vmatmul.mubr.bf16.vlgmr.msra.gmra.mxu1 %v1620_v34  ;;  %752 = vmatprep.mubr.bf16.mxu0 %v1623_v36 }
  0x53   : > { %849 = vmatprep.mubr.bf16.mxu1 %v1625_v37  ;;  %1523 = vmatpush3.bf16.msra.mxu0 %v948_v47 }
  0x54   : > { %1541 = vmatpush3.bf16.msra.mxu1 %v948_v47 }
  0x59   : > { %753 = vmatmul.mubr.bf16.gmra.mxu0 %v1627_v38 }
  0x5a   : > { %850 = vmatmul.mubr.bf16.gmra.mxu1 %v1628_v39  ;;  %760 = vmatprep.mubr.bf16.mxu0 %v1629_v40 }
  0x5b   : > { %857 = vmatprep.mubr.bf16.mxu1 %v1631_v41 }
  0x61   : > { %761 = vmatmul.mubr.bf16.gmra.mxu0 %v1633_v42 }
  0x62   : > { %858 = vmatmul.mubr.bf16.gmra.mxu1 %v1634_v43  ;;  %768 = vmatprep.mubr.bf16.mxu0 %v1635_v44 }
  0x63   : > { %865 = vmatprep.mubr.bf16.mxu1 %v1637_v45 }
  0x69   : > { %769 = vmatmul.mubr.bf16.gmra.mxu0 %v1639_v48 }
  0x6a   : > { %866 = vmatmul.mubr.bf16.gmra.mxu1 %v1640_v49  ;;  %776 = vmatprep.mubr.bf16.mxu0 %v1641_v50 }
  0x6b   : > { %873 = vmatprep.mubr.bf16.mxu1 %v1643_v51 }
  0x71   : > { %777 = vmatmul.mubr.bf16.gmra.mxu0 %v1645_v52 }
  0x72   : > { %874 = vmatmul.mubr.bf16.gmra.mxu1 %v1646_v53  ;;  %784 = vmatprep.mubr.bf16.mxu0 %v1647_v54 }
  0x73   : > { %881 = vmatprep.mubr.bf16.mxu1 %v1649_v55 }
  0x79   : > { %785 = vmatmul.mubr.bf16.gmra.mxu0 %v1651_v56 }
  0x7a   : > { %882 = vmatmul.mubr.bf16.gmra.mxu1 %v1652_v57  ;;  %792 = vmatprep.mubr.bf16.mxu0 %v1653_v58 }
  0x7b   : > { %889 = vmatprep.mubr.bf16.mxu1 %v1655_v59 }
  0x81   : > { %793 = vmatmul.mubr.bf16.gmra.mxu0 %v1657_v60 }
  0x82   : > { %890 = vmatmul.mubr.bf16.gmra.mxu1 %v1658_v61  ;;  %800 = vmatprep.mubr.bf16.mxu0 %v1659_v62 }
  0x83   : > { %897 = vmatprep.mubr.bf16.mxu1 %v1661_v63 }
  0x89   : > { %801 = vmatmul.mubr.bf16.gmra.mxu0 %v1663_v0 }
  0x8a   : > { %898 = vmatmul.mubr.bf16.gmra.mxu1 %v1664_v1 }
 0x111   : > { %v1401_v2 = vpop.f32.mrf.mxu0 }
 0x112   : > { %v1465_v3 = vpop.f32.mrf.mxu1 }
 0x113   : > { %v1402_v4 = vpop.f32.mrf.mxu0 }
 0x114   : > { %v1466_v5 = vpop.f32.mrf.mxu1  ;;  %v1403_v8 = vadd.f32 %v1402_v4, %v1401_v2 }
 0x115   : > { %v1404_v6 = vpop.f32.mrf.mxu0  ;;  %v1467_v9 = vadd.f32 %v1466_v5, %v1465_v3 }
 0x116   : > { %v1468_v7 = vpop.f32.mrf.mxu1 }
 0x117   : > { %v1405_v10 = vpop.f32.mrf.mxu0  ;;  %v844_v16 = vadd.f32 %v1467_v9, %v1403_v8 }
 0x118   : > { %v1406_v11 = vadd.f32 %v1405_v10, %v1404_v6  ;;  %v1469_v12 = vpop.f32.mrf.mxu1 }
 0x119   : > { %v1470_v13 = vadd.f32 %v1469_v12, %v1468_v7  ;;  %v1407_v14 = vpop.f32.mrf.mxu0 }
 0x11a   : > { %v1471_v15 = vpop.f32.mrf.mxu1 }
 0x11b   : > { %v847_v17 = vadd.f32 %v1470_v13, %v1406_v11  ;;  %v1408_v18 = vpop.f32.mrf.mxu0 }
 0x11c   : > { %v1472_v19 = vpop.f32.mrf.mxu1  ;;  %v1409_v23 = vadd.f32 %v1408_v18, %v1407_v14 }
 0x11d   : > { %v906_v20 = vpack.c.bf16 %v847_v17, %v844_v16  ;;  %v1410_v21 = vpop.f32.mrf.mxu0  ;;  %v1473_v24 = vadd.f32 %v1472_v19, %v1471_v15 }
 0x11e   : > { %v1474_v22 = vpop.f32.mrf.mxu1 }
 0x11f   : > { %1524 = vmatprep.mubr.msk.bf16.mxu0 %vm921_vm1, %v906_v20  ;;  %v1411_v25 = vpop.f32.mrf.mxu0  ;;  %v852_v31 = vadd.f32 %v1473_v24, %v1409_v23 }
 0x120   : > { %v1412_v26 = vadd.f32 %v1411_v25, %v1410_v21  ;;  %v1475_v27 = vpop.f32.mrf.mxu1 }
 0x121   : > { %v1476_v28 = vadd.f32 %v1475_v27, %v1474_v22  ;;  %v1413_v29 = vpop.f32.mrf.mxu0 }
 0x122   : > { %v1477_v30 = vpop.f32.mrf.mxu1 }
 0x123   : > { %v855_v32 = vadd.f32 %v1476_v28, %v1412_v26  ;;  %v1414_v33 = vpop.f32.mrf.mxu0 }
 0x124   : > { %v1478_v34 = vpop.f32.mrf.mxu1  ;;  %v1415_v38 = vadd.f32 %v1414_v33, %v1413_v29 }
 0x125   : > { %v907_v35 = vpack.c.bf16 %v855_v32, %v852_v31  ;;  %v1416_v36 = vpop.f32.mrf.mxu0  ;;  %v1479_v39 = vadd.f32 %v1478_v34, %v1477_v30 }
 0x126   : > { %v1480_v37 = vpop.f32.mrf.mxu1 }
 0x127   : > { %1525 = vmatmul.mubr.msk.bf16.vlgmr.msra.gmra.mxu0 %vm921_vm1, %v907_v35  ;;  %v1417_v40 = vpop.f32.mrf.mxu0  ;;  %v860_v46 = vadd.f32 %v1479_v39, %v1415_v38 }
 0x128   : > { %v1418_v41 = vadd.f32 %v1417_v40, %v1416_v36  ;;  %v1481_v42 = vpop.f32.mrf.mxu1 }
 0x129   : > { %v1482_v43 = vadd.f32 %v1481_v42, %v1480_v37  ;;  %v1419_v44 = vpop.f32.mrf.mxu0 }
 0x12a   : > { %v1483_v45 = vpop.f32.mrf.mxu1 }
 0x12b   : > { %v863_v47 = vadd.f32 %v1482_v43, %v1418_v41  ;;  %v1420_v48 = vpop.f32.mrf.mxu0 }
 0x12c   : > { %v1484_v49 = vpop.f32.mrf.mxu1  ;;  %v1421_v53 = vadd.f32 %v1420_v48, %v1419_v44 }
 0x12d   : > { %v908_v50 = vpack.c.bf16 %v863_v47, %v860_v46  ;;  %v1422_v51 = vpop.f32.mrf.mxu0  ;;  %v1485_v54 = vadd.f32 %v1484_v49, %v1483_v45 }
 0x12e   : > { %v1486_v52 = vpop.f32.mrf.mxu1 }
 0x12f   : > { %1528 = vmatprep.mubr.msk.bf16.mxu0 %vm921_vm1, %v908_v50  ;;  %v1423_v55 = vpop.f32.mrf.mxu0  ;;  %v868_v61 = vadd.f32 %v1485_v54, %v1421_v53 }
 0x130   : > { %v1424_v56 = vadd.f32 %v1423_v55, %v1422_v51  ;;  %v1487_v57 = vpop.f32.mrf.mxu1 }
 0x131   : > { %v1488_v58 = vadd.f32 %v1487_v57, %v1486_v52  ;;  %v1425_v59 = vpop.f32.mrf.mxu0 }
 0x132   : > { %v1489_v60 = vpop.f32.mrf.mxu1 }
 0x133   : > { %v871_v62 = vadd.f32 %v1488_v58, %v1424_v56  ;;  %v1426_v63 = vpop.f32.mrf.mxu0  ;;  %v1990_v58 = vld [vmem:[%s2098_s3] ss:$0 sm:$0xff] }
 0x134   : > { %v1490_v0 = vpop.f32.mrf.mxu1  ;;  %v1427_v4 = vadd.f32 %v1426_v63, %v1425_v59 }
 0x135   : > { %v909_v1 = vpack.c.bf16 %v871_v62, %v868_v61  ;;  %v1428_v2 = vpop.f32.mrf.mxu0  ;;  %v1491_v5 = vadd.f32 %v1490_v0, %v1489_v60 }
 0x136   : > { %v1492_v3 = vpop.f32.mrf.mxu1 }
 0x137   : > { %1529 = vmatmul.mubr.msk.bf16.gmra.mxu0 %vm921_vm1, %v909_v1  ;;  %v1429_v6 = vpop.f32.mrf.mxu0  ;;  %v876_v12 = vadd.f32 %v1491_v5, %v1427_v4 }
 0x138   : > { %v1430_v7 = vadd.f32 %v1429_v6, %v1428_v2  ;;  %v1493_v8 = vpop.f32.mrf.mxu1 }
 0x139   : > { %v1494_v9 = vadd.f32 %v1493_v8, %v1492_v3  ;;  %v1431_v10 = vpop.f32.mrf.mxu0 }
 0x13a   : > { %v1495_v11 = vpop.f32.mrf.mxu1 }
 0x13b   : > { %v879_v13 = vadd.f32 %v1494_v9, %v1430_v7  ;;  %v1432_v14 = vpop.f32.mrf.mxu0 }
 0x13c   : > { %v1496_v15 = vpop.f32.mrf.mxu1  ;;  %v1433_v19 = vadd.f32 %v1432_v14, %v1431_v10 }
 0x13d   : > { %v910_v16 = vpack.c.bf16 %v879_v13, %v876_v12  ;;  %v1434_v17 = vpop.f32.mrf.mxu0  ;;  %v1497_v20 = vadd.f32 %v1496_v15, %v1495_v11 }
 0x13e   : > { %v1498_v18 = vpop.f32.mrf.mxu1 }
 0x13f   : > { %1532 = vmatprep.mubr.msk.bf16.mxu1 %vm921_vm1, %v910_v16  ;;  %v1435_v21 = vpop.f32.mrf.mxu0  ;;  %v884_v27 = vadd.f32 %v1497_v20, %v1433_v19 }
 0x140   : > { %v1436_v22 = vadd.f32 %v1435_v21, %v1434_v17  ;;  %v1499_v23 = vpop.f32.mrf.mxu1 }
 0x141   : > { %v1500_v24 = vadd.f32 %v1499_v23, %v1498_v18  ;;  %v1437_v25 = vpop.f32.mrf.mxu0 }
 0x142   : > { %v1501_v26 = vpop.f32.mrf.mxu1 }
 0x143   : > { %v887_v28 = vadd.f32 %v1500_v24, %v1436_v22  ;;  %v1438_v29 = vpop.f32.mrf.mxu0 }
 0x144   : > { %v1502_v30 = vpop.f32.mrf.mxu1  ;;  %v1439_v34 = vadd.f32 %v1438_v29, %v1437_v25 }
 0x145   : > { %v911_v31 = vpack.c.bf16 %v887_v28, %v884_v27  ;;  %v1440_v32 = vpop.f32.mrf.mxu0  ;;  %v1503_v35 = vadd.f32 %v1502_v30, %v1501_v26 }
 0x146   : > { %v1504_v33 = vpop.f32.mrf.mxu1 }
 0x147   : > { %1533 = vmatmul.mubr.msk.bf16.vlgmr.msra.gmra.mxu1 %vm921_vm1, %v911_v31  ;;  %v1441_v36 = vpop.f32.mrf.mxu0  ;;  %v892_v42 = vadd.f32 %v1503_v35, %v1439_v34 }
 0x148   : > { %v1442_v37 = vadd.f32 %v1441_v36, %v1440_v32  ;;  %v1505_v38 = vpop.f32.mrf.mxu1 }
 0x149   : > { %v1506_v39 = vadd.f32 %v1505_v38, %v1504_v33  ;;  %v1443_v40 = vpop.f32.mrf.mxu0 }
 0x14a   : > { %v1507_v41 = vpop.f32.mrf.mxu1 }
 0x14b   : > { %v895_v43 = vadd.f32 %v1506_v39, %v1442_v37  ;;  %v1444_v44 = vpop.f32.mrf.mxu0 }
 0x14c   : > { %v1508_v45 = vpop.f32.mrf.mxu1  ;;  %v1445_v49 = vadd.f32 %v1444_v44, %v1443_v40 }
 0x14d   : > { %v912_v46 = vpack.c.bf16 %v895_v43, %v892_v42  ;;  %v1446_v47 = vpop.f32.mrf.mxu0  ;;  %v1509_v50 = vadd.f32 %v1508_v45, %v1507_v41 }
 0x14e   : > { %v1510_v48 = vpop.f32.mrf.mxu1 }
 0x14f   : > { %1536 = vmatprep.mubr.msk.bf16.mxu1 %vm921_vm1, %v912_v46  ;;  %v1447_v51 = vpop.f32.mrf.mxu0  ;;  %v900_v55 = vadd.f32 %v1509_v50, %v1445_v49 }
 0x150   : > { %v1448_v52 = vadd.f32 %v1447_v51, %v1446_v47  ;;  %v1511_v53 = vpop.f32.mrf.mxu1 }
 0x151   : > { %v1512_v54 = vadd.f32 %v1511_v53, %v1510_v48 }
 0x153   : > { %v903_v56 = vadd.f32 %v1512_v54, %v1448_v52 }
 0x155   : > { %v913_v57 = vpack.c.bf16 %v903_v56, %v900_v55 }
 0x157   : > { %1537 = vmatmul.mubr.msk.bf16.gmra.mxu1 %vm921_vm1, %v913_v57 }
 0x1e7   : > { %v1526_v59 = vpop.f32.mrf.mxu0 }
 0x1e8   : > { %v993_v60 = vadd.f32 %v1526_v59, %v1990_v58 }
 0x1e9   : > { %v984_v61 = vpop.f32.mrf.mxu0 }
 0x1ea   : > { %v1049_v62 = vmax.f32 %v993_v60, 0.0  ;;  %v985_v63 = vadd.f32 %v1990_v58, %v984_v61 }
 0x1eb   : > { %v1527_v0 = vpop.f32.mrf.mxu0 }
 0x1ec   : > { %v1371_v1 = vpack.c.bf16 %v1049_v62, %v1049_v62  ;;  %1147 = vst.msk [vmem:[%s1996_s15 + $0x10] sm:$0xff] %vm1144_vm2, %v1049_v62  ;;  %v1047_v2 = vmax.f32 %v985_v63, 0.0  ;;  %v996_v3 = vadd.f32 %v1527_v0, %v1990_v58 }
 0x1ed   : > { %v987_v4 = vpop.f32.mrf.mxu0 }
 0x1ee   : > { %1130 = vst.msk [vmem:[%s2002_s16 + $0x8] sm:$0xf] %vm1127_vm3, %v1371_v1  ;;  %v1369_v5 = vpack.c.bf16 %v1047_v2, %v1047_v2  ;;  %v1050_v6 = vmax.f32 %v996_v3, 0.0  ;;  %v988_v7 = vadd.f32 %v1990_v58, %v987_v4 }
 0x1ef   : > { %1145 = vst.msk [vmem:[%s1996_s15] sm:$0xff] %vm1144_vm2, %v1047_v2 }
 0x1f0   : > { %1128 = vst.msk [vmem:[%s2002_s16] sm:$0xf] %vm1127_vm3, %v1369_v5  ;;  %v1372_v8 = vpack.c.bf16 %v1050_v6, %v1050_v6  ;;  %v1048_v9 = vmax.f32 %v988_v7, 0.0 }
 0x1f1   : > { %1148 = vst.msk [vmem:[%s1996_s15 + $0x18] sm:$0xff] %vm1144_vm2, %v1050_v6 }
 0x1f2   : > { %1131 = vst.msk [vmem:[%s2002_s16 + $0xc] sm:$0xf] %vm1127_vm3, %v1372_v8  ;;  %v1370_v10 = vpack.c.bf16 %v1048_v9, %v1048_v9 }
 0x1f3   : > { %1146 = vst.msk [vmem:[%s1996_s15 + $0x8] sm:$0xff] %vm1144_vm2, %v1048_v9 }
 0x1f4   : > { %1129 = vst.msk [vmem:[%s2002_s16 + $0x4] sm:$0xf] %vm1127_vm3, %v1370_v10 }
 0x1f7   : > { %v1530_v11 = vpop.f32.mrf.mxu0 }
 0x1f8   : > { %v1009_v12 = vadd.f32 %v1530_v11, %v1990_v58 }
 0x1f9   : > { %v1000_v13 = vpop.f32.mrf.mxu0 }
 0x1fa   : > { %v1053_v14 = vmax.f32 %v1009_v12, 0.0  ;;  %v1001_v15 = vadd.f32 %v1990_v58, %v1000_v13 }
 0x1fb   : > { %v1531_v16 = vpop.f32.mrf.mxu0 }
 0x1fc   : > { %v1375_v17 = vpack.c.bf16 %v1053_v14, %v1053_v14  ;;  %1151 = vst.msk [vmem:[%s1996_s15 + $0x30] sm:$0xff] %vm1144_vm2, %v1053_v14  ;;  %v1051_v18 = vmax.f32 %v1001_v15, 0.0  ;;  %v1012_v19 = vadd.f32 %v1531_v16, %v1990_v58 }
 0x1fd   : > { %v1003_v20 = vpop.f32.mrf.mxu0 }
 0x1fe   : > { %1134 = vst.msk [vmem:[%s2002_s16 + $0x18] sm:$0xf] %vm1127_vm3, %v1375_v17  ;;  %v1373_v21 = vpack.c.bf16 %v1051_v18, %v1051_v18  ;;  %v1054_v22 = vmax.f32 %v1012_v19, 0.0  ;;  %v1004_v23 = vadd.f32 %v1990_v58, %v1003_v20 }
 0x1ff   : > { %1149 = vst.msk [vmem:[%s1996_s15 + $0x20] sm:$0xff] %vm1144_vm2, %v1051_v18 }
 0x200   : > { %1132 = vst.msk [vmem:[%s2002_s16 + $0x10] sm:$0xf] %vm1127_vm3, %v1373_v21  ;;  %v1376_v24 = vpack.c.bf16 %v1054_v22, %v1054_v22  ;;  %v1052_v25 = vmax.f32 %v1004_v23, 0.0 }
 0x201   : > { %1152 = vst.msk [vmem:[%s1996_s15 + $0x38] sm:$0xff] %vm1144_vm2, %v1054_v22 }
 0x202   : > { %1135 = vst.msk [vmem:[%s2002_s16 + $0x1c] sm:$0xf] %vm1127_vm3, %v1376_v24  ;;  %v1374_v26 = vpack.c.bf16 %v1052_v25, %v1052_v25 }
 0x203   : > { %1150 = vst.msk [vmem:[%s1996_s15 + $0x28] sm:$0xff] %vm1144_vm2, %v1052_v25 }
 0x204   : > { %1133 = vst.msk [vmem:[%s2002_s16 + $0x14] sm:$0xf] %vm1127_vm3, %v1374_v26 }
 0x207   : > { %v1534_v27 = vpop.f32.mrf.mxu1 }
 0x208   : > { %v1025_v28 = vadd.f32 %v1534_v27, %v1990_v58 }
 0x209   : > { %v1016_v29 = vpop.f32.mrf.mxu1 }
 0x20a   : > { %v1057_v30 = vmax.f32 %v1025_v28, 0.0  ;;  %v1017_v31 = vadd.f32 %v1990_v58, %v1016_v29 }
 0x20b   : > { %v1535_v32 = vpop.f32.mrf.mxu1 }
 0x20c   : > { %v1379_v33 = vpack.c.bf16 %v1057_v30, %v1057_v30  ;;  %1155 = vst.msk [vmem:[%s1996_s15 + $0x50] sm:$0xff] %vm1144_vm2, %v1057_v30  ;;  %v1055_v34 = vmax.f32 %v1017_v31, 0.0  ;;  %v1028_v35 = vadd.f32 %v1535_v32, %v1990_v58 }
 0x20d   : > { %v1019_v36 = vpop.f32.mrf.mxu1 }
 0x20e   : > { %1138 = vst.msk [vmem:[%s2002_s16 + $0x28] sm:$0xf] %vm1127_vm3, %v1379_v33  ;;  %v1377_v37 = vpack.c.bf16 %v1055_v34, %v1055_v34  ;;  %v1058_v38 = vmax.f32 %v1028_v35, 0.0  ;;  %v1020_v39 = vadd.f32 %v1990_v58, %v1019_v36 }
 0x20f   : > { %1153 = vst.msk [vmem:[%s1996_s15 + $0x40] sm:$0xff] %vm1144_vm2, %v1055_v34 }
 0x210   : > { %1136 = vst.msk [vmem:[%s2002_s16 + $0x20] sm:$0xf] %vm1127_vm3, %v1377_v37  ;;  %v1380_v40 = vpack.c.bf16 %v1058_v38, %v1058_v38  ;;  %v1056_v41 = vmax.f32 %v1020_v39, 0.0 }
 0x211   : > { %1156 = vst.msk [vmem:[%s1996_s15 + $0x58] sm:$0xff] %vm1144_vm2, %v1058_v38 }
 0x212   : > { %1139 = vst.msk [vmem:[%s2002_s16 + $0x2c] sm:$0xf] %vm1127_vm3, %v1380_v40  ;;  %v1378_v42 = vpack.c.bf16 %v1056_v41, %v1056_v41 }
 0x213   : > { %1154 = vst.msk [vmem:[%s1996_s15 + $0x48] sm:$0xff] %vm1144_vm2, %v1056_v41 }
 0x214   : > { %1137 = vst.msk [vmem:[%s2002_s16 + $0x24] sm:$0xf] %vm1127_vm3, %v1378_v42 }
 0x217   : > { %v1538_v43 = vpop.f32.mrf.mxu1 }
 0x218   : > { %v1041_v44 = vadd.f32 %v1538_v43, %v1990_v58 }
 0x219   : > { %v1032_v45 = vpop.f32.mrf.mxu1 }
 0x21a   : > { %v1061_v46 = vmax.f32 %v1041_v44, 0.0  ;;  %v1033_v47 = vadd.f32 %v1990_v58, %v1032_v45 }
 0x21b   : > { %v1539_v48 = vpop.f32.mrf.mxu1 }
 0x21c   : > { %v1383_v49 = vpack.c.bf16 %v1061_v46, %v1061_v46  ;;  %1159 = vst.msk [vmem:[%s1996_s15 + $0x70] sm:$0xff] %vm1144_vm2, %v1061_v46  ;;  %v1059_v50 = vmax.f32 %v1033_v47, 0.0  ;;  %v1044_v51 = vadd.f32 %v1539_v48, %v1990_v58 }
 0x21d   : > { %v1035_v52 = vpop.f32.mrf.mxu1 }
 0x21e   : > { %1142 = vst.msk [vmem:[%s2002_s16 + $0x38] sm:$0xf] %vm1127_vm3, %v1383_v49  ;;  %v1381_v53 = vpack.c.bf16 %v1059_v50, %v1059_v50  ;;  %v1062_v54 = vmax.f32 %v1044_v51, 0.0  ;;  %v1036_v55 = vadd.f32 %v1990_v58, %v1035_v52 }
 0x21f   : > { %1157 = vst.msk [vmem:[%s1996_s15 + $0x60] sm:$0xff] %vm1144_vm2, %v1059_v50 }
 0x220   : > { %1140 = vst.msk [vmem:[%s2002_s16 + $0x30] sm:$0xf] %vm1127_vm3, %v1381_v53  ;;  %v1384_v56 = vpack.c.bf16 %v1062_v54, %v1062_v54  ;;  %v1060_v57 = vmax.f32 %v1036_v55, 0.0 }
 0x221   : > { %1160 = vst.msk [vmem:[%s1996_s15 + $0x78] sm:$0xff] %vm1144_vm2, %v1062_v54 }
 0x222   : > { %1143 = vst.msk [vmem:[%s2002_s16 + $0x3c] sm:$0xf] %vm1127_vm3, %v1384_v56  ;;  %v1382_v59 = vpack.c.bf16 %v1060_v57, %v1060_v57 }
 0x223   : > { %1158 = vst.msk [vmem:[%s1996_s15 + $0x68] sm:$0xff] %vm1144_vm2, %v1060_v57 }
 0x224   : > { %1141 = vst.msk [vmem:[%s2002_s16 + $0x34] sm:$0xf] %vm1127_vm3, %v1382_v59 }
 0x225 PF: > { %p16_p9 = scmp.ge.s32.totalorder %s1782_s23, 6   ;;  %s2106_s18 = smov %s1719_s19 }
 0x226   : > { %s2107_s19 = smov %s1723_s20  ;;  %s2108_s20 = smov %s1792_s26 }
 0x227   : > { %s2109_s21 = smov %s1782_s23  ;;  %18 = sbr.rel (!%p16_p9) target bundleno = 3 (0x3), region = 88 }
 0x22c   :  { %1200 = vsyncpa [#allocation3], 1 }
 0x22d   :  { %1202 = vsyncpa [#allocation3 + $0x1], 1 }

</bundles_post_ra>
